<compile_context>
chip_gen: v6e
topology: v6e:2x2x1
jax: 0.10.0
libtpu: 0.0.40
codegen_flags: <defaults>
</compile_context>

<pallas_src>
import math

import jax
import jax.numpy as jnp
from jax.experimental import pallas as pl
from jax.experimental.pallas import tpu as pltpu


def _round_up(x, m):
    return (x + m - 1) // m * m


def _cdiv(a, b):
    return (a + b - 1) // b


# ---------------------------------------------------------------------------
# Kernels
# ---------------------------------------------------------------------------

def _ffn_kernel_resident(x_ref, w1_ref, b1_ref, w2_ref, b2_ref, o_ref, h_ref):
    """Weights fully VMEM-resident: 1-D grid over token tiles, no reduction axis."""
    cdt = w1_ref.dtype
    x = x_ref[...].astype(cdt)
    h = jnp.dot(x, w1_ref[...], preferred_element_type=jnp.float32)
    # bias + ReLU in f32 vregs, single cast into the compute-dtype scratch.
    h_ref[...] = jnp.maximum(h + b1_ref[...], 0.0).astype(cdt)
    # TODO(synk): training-mode dropout (pltpu.prng_seed + stateful_bernoulli)
    # not implemented; eval-mode dropout is identity.
    out = jnp.dot(h_ref[...], w2_ref[...], preferred_element_type=jnp.float32)
    o_ref[...] = (out + b2_ref[...]).astype(o_ref.dtype)


def _ffn_kernel_tiled(x_ref, w1_ref, b1_ref, w2_ref, b2_ref, o_ref,
                      h_ref, acc_ref):
    """H tiled as a reduction grid axis with an f32 VMEM accumulator."""
    j = pl.program_id(1)

    @pl.when(j == 0)
    def _():
        acc_ref[...] = jnp.zeros_like(acc_ref)

    cdt = w1_ref.dtype
    x = x_ref[...].astype(cdt)
    h = jnp.dot(x, w1_ref[...], preferred_element_type=jnp.float32)
    h_ref[...] = jnp.maximum(h + b1_ref[...], 0.0).astype(cdt)
    acc_ref[...] += jnp.dot(h_ref[...], w2_ref[...],
                            preferred_element_type=jnp.float32)

    @pl.when(j == pl.num_programs(1) - 1)
    def _():
        o_ref[...] = (acc_ref[...] + b2_ref[...]).astype(o_ref.dtype)


# ---------------------------------------------------------------------------
# Tile selection / VMEM budgeting
# ---------------------------------------------------------------------------

def _vmem_budget_bytes():
    """~80% of the physical VMEM capacity (generation-aware), 64 MiB fallback."""
    cap = 64 * 1024 * 1024  # conservative: v7x per-TensorCore VMEM
    try:
        info_cap = int(pltpu.get_tpu_info().vmem_capacity_bytes)
        if info_cap > 0:
            cap = info_cap
    except Exception:
        pass
    return int(cap * 0.80)


def _select_config(N, D, H, x_itemsize, w_itemsize, out_itemsize,
                   tm_target, budget):
    # Sub-32-bit compute dtypes pack along sublanes -> keep tm a multiple of 16.
    sub = 16 if w_itemsize < 4 else 8
    D_pad = _round_up(D, 128)
    H128 = _round_up(H, 128)

    def need(tm, tk, resident):
        n = (2 * tm * D_pad * x_itemsize        # x tile (double-buffered)
             + 2 * D_pad * tk * w_itemsize      # W1 tile
             + 2 * tk * D_pad * w_itemsize      # W2 tile
             + 2 * tk * 4 + 2 * D_pad * 4       # biases (f32)
             + 2 * tm * D_pad * out_itemsize    # out tile
             + tm * tk * w_itemsize)            # h scratch (compute dtype)
        if not resident:
            n += tm * D_pad * 4                 # f32 accumulator
        return n

    # Token tile: as large as tm_target, but keep >= 2 grid blocks when N
    # allows so the "parallel" axis can shard across v7x's two TensorCores.
    if N >= 2 * sub:
        tm0 = min(_round_up(tm_target, sub), _round_up(_cdiv(N, 2), sub))
    else:
        tm0 = _round_up(max(N, 1), sub)

    tm_candidates = sorted({tm0,
                            _round_up(max(tm0 // 2, sub), sub),
                            _round_up(max(tm0 // 4, sub), sub),
                            sub}, reverse=True)
    # Hidden-dim tiles prefer multiples of 256 (v6e/v7x MXU is 2x256x256).
    tk_candidates = [t for t in (4096, 2048, 1024, 512, 256, 128) if t <= H128]
    if not tk_candidates:
        tk_candidates = [H128]

    for tm in tm_candidates:
        # Weights-resident config: weights DMA'd once, no accumulator RMW.
        if need(tm, H128, True) <= budget:
            return dict(tm=tm, tk=H128, H_pad=H128, D_pad=D_pad,
                        resident=True, vmem_need=need(tm, H128, True))
        for tk in tk_candidates:
            if need(tm, tk, False) <= budget:
                return dict(tm=tm, tk=tk, H_pad=_round_up(H, tk), D_pad=D_pad,
                            resident=False, vmem_need=need(tm, tk, False))
    # Last-ditch fallback: smallest tiles; VMEM request clamped to the budget.
    tm, tk = sub, 128
    return dict(tm=tm, tk=tk, H_pad=_round_up(H, tk), D_pad=D_pad,
                resident=False, vmem_need=min(need(tm, tk, False), budget))


# ---------------------------------------------------------------------------
# Wrapper
# ---------------------------------------------------------------------------

def pointwise_ffn(x, w1, b1, w2, b2, *, tm=512, compute_dtype=jnp.bfloat16):
    """y = W2(ReLU(W1 x + b1)) + b2  (eval-mode dropout == identity).

    x: (B, S, D).  w1: (D, H), b1: (H,), w2: (H, D), b2: (D,)  -- weights are
    stored pre-transposed (in, out), unlike torch.nn.Linear's (out, in).
    """
    B, S, D = x.shape
    Din, H = w1.shape
    assert Din == D and w2.shape == (H, D) and b1.shape == (H,) and b2.shape == (D,)
    N = B * S
    out_dtype = x.dtype

    x_itemsize = jnp.dtype(x.dtype).itemsize
    w_itemsize = jnp.dtype(compute_dtype).itemsize
    out_itemsize = jnp.dtype(out_dtype).itemsize

    budget = _vmem_budget_bytes()
    cfg = _select_config(N, D, H, x_itemsize, w_itemsize, out_itemsize, tm, budget)
    tm_eff, tk_eff = cfg["tm"], cfg["tk"]
    D_pad, H_pad = cfg["D_pad"], cfg["H_pad"]
    N_pad = _round_up(N, tm_eff)

    # x stays in its input dtype (cast to the MXU compute dtype inside the
    # kernel); pad only when the shape needs it -> no extra HBM pass for
    # already-aligned inputs.
    x2 = x.reshape(N, D)
    if N_pad != N or D_pad != D:
        x2 = jnp.pad(x2, ((0, N_pad - N), (0, D_pad - D)))

    # Weight/bias prep is call-invariant; in a real model this pad+cast should
    # be hoisted out of the per-token call path (done once at parameter load).
    w1p = w1 if (D_pad == D and H_pad == H) else jnp.pad(
        w1, ((0, D_pad - D), (0, H_pad - H)))
    w2p = w2 if (H_pad == H and D_pad == D) else jnp.pad(
        w2, ((0, H_pad - H), (0, D_pad - D)))
    w1p = w1p.astype(compute_dtype)
    w2p = w2p.astype(compute_dtype)
    b1p = jnp.pad(b1, (0, H_pad - H)).astype(jnp.float32).reshape(1, H_pad)
    b2p = jnp.pad(b2, (0, D_pad - D)).astype(jnp.float32).reshape(1, D_pad)

    vmem_limit = int(min(budget,
                         max(int(cfg["vmem_need"] * 1.5), 32 * 1024 * 1024)))

    cost = pl.CostEstimate(
        flops=4 * N_pad * D_pad * H_pad,
        transcendentals=0,
        bytes_accessed=int(N_pad * D_pad * (x_itemsize + out_itemsize)
                           + 2 * D_pad * H_pad * w_itemsize
                           + (H_pad + D_pad) * 4),
    )

    if cfg["resident"]:
        grid_spec = pltpu.PrefetchScalarGridSpec(
            num_scalar_prefetch=0,
            grid=(N_pad // tm_eff,),
            in_specs=[
                pl.BlockSpec((tm_eff, D_pad), lambda i: (i, 0)),   # x tile
                pl.BlockSpec((D_pad, H_pad), lambda i: (0, 0)),    # W1 (resident)
                pl.BlockSpec((1, H_pad), lambda i: (0, 0)),        # b1
                pl.BlockSpec((H_pad, D_pad), lambda i: (0, 0)),    # W2 (resident)
                pl.BlockSpec((1, D_pad), lambda i: (0, 0)),        # b2
            ],
            out_specs=pl.BlockSpec((tm_eff, D_pad), lambda i: (i, 0)),
            scratch_shapes=[
                pltpu.VMEM((tm_eff, H_pad), compute_dtype),        # h scratch
            ],
        )
        kernel = _ffn_kernel_resident
        dims = ("parallel",)
    else:
        grid_spec = pltpu.PrefetchScalarGridSpec(
            num_scalar_prefetch=0,
            grid=(N_pad // tm_eff, H_pad // tk_eff),
            in_specs=[
                pl.BlockSpec((tm_eff, D_pad), lambda i, j: (i, 0)),  # x tile
                pl.BlockSpec((D_pad, tk_eff), lambda i, j: (0, j)),  # W1 cols
                pl.BlockSpec((1, tk_eff), lambda i, j: (0, j)),      # b1
                pl.BlockSpec((tk_eff, D_pad), lambda i, j: (j, 0)),  # W2 rows
                pl.BlockSpec((1, D_pad), lambda i, j: (0, 0)),       # b2
            ],
            out_specs=pl.BlockSpec((tm_eff, D_pad), lambda i, j: (i, 0)),
            scratch_shapes=[
                pltpu.VMEM((tm_eff, tk_eff), compute_dtype),   # h (compute dtype)
                pltpu.VMEM((tm_eff, D_pad), jnp.float32),      # f32 accumulator
            ],
        )
        kernel = _ffn_kernel_tiled
        dims = ("parallel", "arbitrary")

    out = pl.pallas_call(
        kernel,
        out_shape=jax.ShapeDtypeStruct((N_pad, D_pad), out_dtype),
        grid_spec=grid_spec,
        compiler_params=pltpu.CompilerParams(
            dimension_semantics=dims,
            vmem_limit_bytes=vmem_limit,
        ),
        cost_estimate=cost,
    )(x2, w1p, b1p, w2p, b2p)

    if N_pad != N or D_pad != D:
        out = out[:N, :D]
    return out.reshape(B, S, D)


def init_params(key, input_dim, hidden_dim):
    """Deterministic init mimicking nn.Linear's uniform(-1/sqrt(fan_in), ...)."""
    k1, k2, k3, k4 = jax.random.split(key, 4)
    bound1 = 1.0 / math.sqrt(input_dim)
    bound2 = 1.0 / math.sqrt(hidden_dim)
    # stored pre-transposed: (in, out)
    w1 = jax.random.uniform(k1, (input_dim, hidden_dim), jnp.float32, -bound1, bound1)
    b1 = jax.random.uniform(k2, (hidden_dim,), jnp.float32, -bound1, bound1)
    w2 = jax.random.uniform(k3, (hidden_dim, input_dim), jnp.float32, -bound2, bound2)
    b2 = jax.random.uniform(k4, (input_dim,), jnp.float32, -bound2, bound2)
    return w1, b1, w2, b2


if __name__ == "__main__":
    key = jax.random.PRNGKey(0)
    kx, kp = jax.random.split(key)

    B, S, D, H = 2, 8, 32, 64          # batch, seq, input_dim, hidden_dim
    x = jax.random.normal(kx, (B, S, D), jnp.float32)
    w1, b1, w2, b2 = init_params(kp, D, H)

    # reference in plain JAX (eval-mode dropout == identity)
    ref = jnp.maximum(x @ w1 + b1, 0.0) @ w2 + b2

    # f32 compute path: tight tolerance.
    y32 = jax.block_until_ready(
        pointwise_ffn(x, w1, b1, w2, b2, compute_dtype=jnp.float32))
    assert y32.shape == (B, S, D)
    assert jnp.allclose(y32, ref, atol=1e-4, rtol=1e-4), "f32 mismatch vs reference"

    # bf16 fast path (recommended): f32 accumulation, looser tolerance.
    ybf = jax.block_until_ready(
        pointwise_ffn(x, w1, b1, w2, b2, compute_dtype=jnp.bfloat16))
    assert ybf.shape == (B, S, D)
    assert jnp.allclose(ybf, ref, atol=3e-2, rtol=3e-2), "bf16 mismatch vs reference"

    print("KERNEL_OK")
</pallas_src>

<mosaic_0001>
module attributes {stable_mosaic.version = 11 : i64} {
  func.func @_ffn_kernel_resident(%arg0: i32, %arg1: memref<8x128xf32, #tpu.memory_space<vmem>>, %arg2: memref<128x128xf32, #tpu.memory_space<vmem>>, %arg3: memref<1x128xf32, #tpu.memory_space<vmem>>, %arg4: memref<128x128xf32, #tpu.memory_space<vmem>>, %arg5: memref<1x128xf32, #tpu.memory_space<vmem>>, %arg6: memref<8x128xf32, #tpu.memory_space<vmem>>, %arg7: memref<8x128xf32, #tpu.memory_space<vmem>>) attributes {dimension_semantics = [#tpu.dimension_semantics<parallel>], iteration_bounds = array<i64: 2>, scalar_prefetch = 0 : i64, scratch_operands = 1 : i64, tpu.core_type = #tpu.core_type<tc>, window_params = [{transform_indices = @transform_0, window_bounds = array<i64: 8, 128>}, {pipeline_mode = #tpu.pipeline_mode<synchronous>, transform_indices = @transform_1, window_bounds = array<i64: 128, 128>}, {pipeline_mode = #tpu.pipeline_mode<synchronous>, transform_indices = @transform_2, window_bounds = array<i64: 1, 128>}, {pipeline_mode = #tpu.pipeline_mode<synchronous>, transform_indices = @transform_3, window_bounds = array<i64: 128, 128>}, {pipeline_mode = #tpu.pipeline_mode<synchronous>, transform_indices = @transform_4, window_bounds = array<i64: 1, 128>}, {transform_indices = @transform_5, window_bounds = array<i64: 8, 128>}]} {
    %c0 = arith.constant 0 : index
    %c0_0 = arith.constant 0 : index
    %0 = vector.load %arg1[%c0, %c0_0] : memref<8x128xf32, #tpu.memory_space<vmem>>, vector<8x128xf32>
    %c0_1 = arith.constant 0 : index
    %c0_2 = arith.constant 0 : index
    %1 = vector.load %arg2[%c0_1, %c0_2] : memref<128x128xf32, #tpu.memory_space<vmem>>, vector<128x128xf32>
    %cst = arith.constant dense<0.000000e+00> : vector<8x128xf32>
    %2 = tpu.matmul %0, %1, %cst {dimension_numbers = #tpu.dot_dimension_numbers<[1], [0], [0], [1], [0, 0, 1, 1], [], []>} : vector<8x128xf32>, vector<128x128xf32>, vector<8x128xf32> -> vector<8x128xf32>
    %c0_3 = arith.constant 0 : index
    %c0_4 = arith.constant 0 : index
    %3 = vector.load %arg3[%c0_3, %c0_4] : memref<1x128xf32, #tpu.memory_space<vmem>>, vector<1x128xf32>
    %4 = vector.broadcast %3 : vector<1x128xf32> to vector<8x128xf32>
    %5 = arith.addf %2, %4 : vector<8x128xf32>
    %cst_5 = arith.constant 0.000000e+00 : f32
    %6 = vector.broadcast %cst_5 : f32 to vector<8x128xf32>
    %7 = arith.maximumf %5, %6 : vector<8x128xf32>
    %c0_6 = arith.constant 0 : index
    %c0_7 = arith.constant 0 : index
    %8 = vector.load %arg7[%c0_6, %c0_7] : memref<8x128xf32, #tpu.memory_space<vmem>>, vector<8x128xf32>
    tpu.vector_store %arg7[%c0_6, %c0_7], %7 {strides = array<i32>} : memref<8x128xf32, #tpu.memory_space<vmem>>, vector<8x128xf32>,
    %c0_8 = arith.constant 0 : index
    %c0_9 = arith.constant 0 : index
    %9 = vector.load %arg7[%c0_8, %c0_9] : memref<8x128xf32, #tpu.memory_space<vmem>>, vector<8x128xf32>
    %c0_10 = arith.constant 0 : index
    %c0_11 = arith.constant 0 : index
    %10 = vector.load %arg4[%c0_10, %c0_11] : memref<128x128xf32, #tpu.memory_space<vmem>>, vector<128x128xf32>
    %cst_12 = arith.constant dense<0.000000e+00> : vector<8x128xf32>
    %11 = tpu.matmul %9, %10, %cst_12 {dimension_numbers = #tpu.dot_dimension_numbers<[1], [0], [0], [1], [0, 0, 1, 1], [], []>} : vector<8x128xf32>, vector<128x128xf32>, vector<8x128xf32> -> vector<8x128xf32>
    %c0_13 = arith.constant 0 : index
    %c0_14 = arith.constant 0 : index
    %12 = vector.load %arg5[%c0_13, %c0_14] : memref<1x128xf32, #tpu.memory_space<vmem>>, vector<1x128xf32>
    %13 = vector.broadcast %12 : vector<1x128xf32> to vector<8x128xf32>
    %14 = arith.addf %11, %13 : vector<8x128xf32>
    %c0_15 = arith.constant 0 : index
    %c0_16 = arith.constant 0 : index
    %15 = vector.load %arg6[%c0_15, %c0_16] : memref<8x128xf32, #tpu.memory_space<vmem>>, vector<8x128xf32>
    tpu.vector_store %arg6[%c0_15, %c0_16], %14 {strides = array<i32>} : memref<8x128xf32, #tpu.memory_space<vmem>>, vector<8x128xf32>,
    return
  }
  func.func @transform_0(%arg0: i32) -> (i32, i32) {
    %c0_i32 = arith.constant 0 : i32
    %c0_i32_0 = arith.constant 0 : i32
    return %arg0, %c0_i32 : i32, i32
  }
  func.func @transform_1(%arg0: i32) -> (i32, i32) {
    %c0_i32 = arith.constant 0 : i32
    %c0_i32_0 = arith.constant 0 : i32
    %c0_i32_1 = arith.constant 0 : i32
    return %c0_i32, %c0_i32_0 : i32, i32
  }
  func.func @transform_2(%arg0: i32) -> (i32, i32) {
    %c0_i32 = arith.constant 0 : i32
    %c0_i32_0 = arith.constant 0 : i32
    %c0_i32_1 = arith.constant 0 : i32
    return %c0_i32, %c0_i32_0 : i32, i32
  }
  func.func @transform_3(%arg0: i32) -> (i32, i32) {
    %c0_i32 = arith.constant 0 : i32
    %c0_i32_0 = arith.constant 0 : i32
    %c0_i32_1 = arith.constant 0 : i32
    return %c0_i32, %c0_i32_0 : i32, i32
  }
  func.func @transform_4(%arg0: i32) -> (i32, i32) {
    %c0_i32 = arith.constant 0 : i32
    %c0_i32_0 = arith.constant 0 : i32
    %c0_i32_1 = arith.constant 0 : i32
    return %c0_i32, %c0_i32_0 : i32, i32
  }
  func.func @transform_5(%arg0: i32) -> (i32, i32) {
    %c0_i32 = arith.constant 0 : i32
    %c0_i32_0 = arith.constant 0 : i32
    return %arg0, %c0_i32 : i32, i32
  }
}

</mosaic_0001>

<bundles_post_ra>
// kernel: tpu_custom_call.1
= control target key start
LH: loop header
LB: loop body
LE: loop exit
PB: predicated region body
PF: predicated region fallthrough
CT: control target
= control target key end

     0   :  { %10 = vsyncpa [#allocation4], 0  ;;  %s1162_s0 = inlined_call_operand.hbm [shape: f32[16,128], index: 0, kind: input, shape index: {}]   ;;  %s1163_s1 = inlined_call_operand.hbm [shape: f32[128,128], index: 1, kind: input, shape index: {}]   ;;  %s1164_s2 = inlined_call_operand.vmem [shape: f32[1,128], index: 2, kind: input, shape index: {}]   ;;  %s1165_s3 = inlined_call_operand.hbm [shape: f32[128,128], index: 3, kind: input, shape index: {}]   ;;  %s1166_s4 = inlined_call_operand.vmem [shape: f32[1,128], index: 4, kind: input, shape index: {}]   ;;  %s1167_s5 = inlined_call_operand.hbm [shape: f32[16,128], index: 5, kind: output, shape index: {}]  }
   0x1   :  { %12 = vsyncpa [#allocation4 + $0x1], 0 }
   0x2   :  { %13 = vsyncpa [#allocation7], 0 }
   0x3   :  { %14 = vsyncpa [#allocation5], 0 }
   0x4   :  { %16 = vsyncpa [#allocation5 + $0x1], 0  ;;  %s944_s18 = smov 0   ;;  %s946_s19 = smov 0  }
   0x5   :  { %s948_s20 = smov 0   ;;  %s950_s21 = smov 0  }
   0x6 LB: > { %s965_s22 = sadd.s32 4294967295, %s904_s21   ;;  %s563_s23 = sadd.s32 4294967294, %s904_s21   ;;  %s904_s21 = sphi %s950_s21, %s1189_s21   ;;  %s900_s20 = sphi %s948_s20, %s1188_s20   ;;  %s896_s19 = sphi %s946_s19, %s1187_s19   ;;  %s892_s18 = sphi %s944_s18, %s1186_s18  }
   0x7   : > { %p42_p0 = scmp.ne.s32.totalorder %s896_s19, %s892_s18  ;;  %p1168_p1 = scmp.eq.s32.totalorder %s965_s22, 0 }
   0x8   : > { %p156_p3 = scmp.eq.s32.totalorder %s563_s23, 1  ;;  %p564_p5 = scmp.ge.s32.totalorder %s904_s21, 1 }
   0x9   : > { %p974_p4 = por %p1168_p1, %p42_p0  ;;  %p163_p7 = scmp.lt.s32.totalorder %s904_s21, 3 }
   0xa   : > { %p979_p6 = por %p156_p3, %p42_p0  ;;  %s906_s27 = smov [#allocation6]  }
   0xb   : > { %s1172_s24 = scalar_select %p974_p4, 1, 0 }
   0xc   : > { %s1173_s25 = scalar_select %p979_p6, 1, 0 }
   0xd   : > { %p984_p8 = pnand %p564_p5, %p163_p7  ;;  %s175_s28 = sshll.u32 %s906_s27, 4  ;;  %s176_s28 = int_to_ptr.vmem [resolvable:$true] %s175_s28 }
   0xe   : > { %s907_s30 = smov [#allocation8]   ;;  %s767_s7 = scalar_lea.vmem %s176_s28, 2048 }
   0xf   : > { %s1174_s26 = scalar_select %p984_p8, 1, 0 }
  0x10   : > { %p697_p9 = pneg %p984_p8  ;;  %s191_s6 = sshll.u32 %s907_s30, 4  ;;  %s192_s6 = int_to_ptr.vmem [resolvable:$true] %s191_s6 }
  0x11   : > { %p768_p13 = scmp.ne.s32.totalorder %s176_s28, %s767_s7  ;;  %p775_p5 = scmp.lt.s32.totalorder %s176_s28, %s176_s28 }
  0x12   : > { %p993_p11 = pnand %p697_p9, %p1168_p1  ;;  %p776_p7 = scmp.lt.s32.totalorder %s767_s7, %s767_s7 }
  0x14   : > { %p758_p12 = pneg %p993_p11  ;;  %p777_p10 = por %p776_p7, %p775_p5 }
  0x16   : > { %p770_p0 = pnand %p768_p13, %p758_p12 }
  0x18   : > { %p771_p3 = pneg %p770_p0 }
  0x1a   : > { %p778_p9 = pnand %p777_p10, %p771_p3 }
  0x1c   : > { %781 = shalt.err (!%p778_p9)
}
  0x1d   : > { %s908_s8 = smov 128   ;;  %s909_s9 = smov 8  }
  0x1e   : > { %700 = dma.hbm_to_vmem [thread:$0]  (!%p993_p11), %s1163_s1, 2048, %s176_s28, [#allocation7], %s908_s8, %s908_s8, %s909_s9  }
  0x1f   : > { %s793_s12 = scalar_lea.vmem %s192_s6, 2048  ;;  %p801_p2 = scmp.lt.s32.totalorder %s192_s6, %s192_s6 }
  0x20   : > { %p794_p1 = scmp.ne.s32.totalorder %s192_s6, %s793_s12  ;;  %p802_p6 = scmp.lt.s32.totalorder %s793_s12, %s793_s12 }
  0x22   : > { %p796_p13 = pnand %p794_p1, %p758_p12  ;;  %p803_p5 = por %p802_p6, %p801_p2 }
  0x24   : > { %p797_p0 = pneg %p796_p13 }
  0x26   : > { %p804_p10 = pnand %p803_p5, %p797_p0 }
  0x28   : > { %807 = shalt.err (!%p804_p10)
}
  0x29   : > { %703 = dma.hbm_to_vmem [thread:$0]  (!%p993_p11), %s1165_s3, 2048, %s192_s6, [#allocation7], %s908_s8, %s908_s8, %s909_s9  }
  0x2a   : > { %s1016_s15 = sadd.s32 1, %s904_s21   ;;  %s29_s16 = sadd.s32 1, %s900_s20 }
  0x2b   : > { %s26_s17 = ssub.s32 %s904_s21, %s1016_s15  ;;  %p36_p1 = scmp.ne.s32.totalorder %s900_s20, %s896_s19 }
  0x2c   : > { %p27_p2 = scmp.eq.s32.totalorder %s26_s17, 0  ;;  %p37_p6 = scmp.eq.s32.totalorder %s904_s21, 0 }
  0x2d   : > { %p1176_p12 = scmp.eq.s32.totalorder %s965_s22, 1  ;;  %p714_p7 = scmp.lt.s32.totalorder %s904_s21, 2 }
  0x2e   : > { %s1032_s27 = scalar_select %p27_p2, %s900_s20, %s29_s16  }
  0x2f   : > { %p1026_p3 = por %p1176_p12, %p36_p1  ;;  %p38_p9 = por %p37_p6, %p36_p1 }
  0x30   : > { %s208_s28 = sand.u32 1, %s900_s20   ;;  %s569_s30 = sshll.u32 %s904_s21, 7 }
  0x31   : > { %s1177_s23 = scalar_select %p1026_p3, 1, 0 }
  0x32   : > { %s568_s29 = sshll.u32 %s208_s28, 3  ;;  %s1039_s8 = scalar_lea.hbm %s1162_s0, %s569_s30 }
  0x33   : > { %s212_s9 = scalar_lea.vmem [#allocation3], %s568_s29  ;;  %p1041_p11 = pnand %p714_p7, %p38_p9 }
  0x34   : > { %s219_s10 = sshll.u32 %s212_s9, 4  ;;  %s209_s12 = scalar_lea.sflag [#allocation4], %s208_s28  ;;  %s220_s10 = int_to_ptr.vmem [resolvable:$true] %s219_s10 }
  0x35   : > { %s808_s13 = scalar_lea.hbm %s1039_s8, 128  ;;  %p810_p0 = pneg %p1041_p11 }
  0x36   : > { %p809_p13 = scmp.ne.s32.totalorder %s1039_s8, %s808_s13  ;;  %s813_s17 = scalar_lea.hbm %s1162_s0, 256 }
  0x37   : > { %p814_p1 = scmp.lt.s32.totalorder %s1039_s8, %s1162_s0  ;;  %p815_p2 = scmp.lt.s32.totalorder %s813_s17, %s808_s13 }
  0x38   : > { %p811_p5 = pnand %p810_p0, %p809_p13 }
  0x39   : > { %p816_p6 = por %p815_p2, %p814_p1 }
  0x3a   : > { %p812_p10 = pneg %p811_p5 }
  0x3c   : > { %p817_p12 = pnand %p816_p6, %p812_p10 }
  0x3e   : > { %820 = shalt.err (!%p817_p12)
}
  0x3f   : > { %s821_s6 = scalar_lea.vmem %s220_s10, 128  ;;  %s910_s28 = smov [#allocation3]  }
  0x40   : > { %p822_p7 = scmp.ne.s32.totalorder %s220_s10, %s821_s6  ;;  %s826_s7 = sshll.u32 %s910_s28, 4  ;;  %s827_s7 = int_to_ptr.vmem [resolvable:$false] %s826_s7 }
  0x41   : > { %s828_s9 = scalar_lea.vmem %s827_s7, 256  ;;  %p829_p13 = scmp.lt.s32.totalorder %s220_s10, %s827_s7 }
  0x42   : > { %p824_p9 = pnand %p822_p7, %p810_p0  ;;  %p830_p5 = scmp.lt.s32.totalorder %s828_s9, %s821_s6 }
  0x44   : > { %p825_p3 = pneg %p824_p9  ;;  %p831_p4 = por %p830_p5, %p829_p13 }
  0x46   : > { %p832_p8 = pnand %p831_p4, %p825_p3 }
  0x48   : > { %835 = shalt.err (!%p832_p8)
}
  0x49   : > { %707 = dma.hbm_to_vmem [thread:$0]  (!%p1041_p11), %s1039_s8, 128, %s220_s10, %s209_s12  }
  0x4a   : > { %p1179_p10 = scmp.ne.s32.totalorder %s1174_s26, 0 }
  0x4b   : > { %s1062_s13 = sand.u32 (!%p1179_p10), 1, %s896_s19   ;;  %p1180_p4 = scmp.ne.s32.totalorder (!%p1179_p10), %s1172_s24, 0 }
  0x4c   : > { %228 = sbr.rel (%p1179_p10) target bundleno = 524 (0x20c), region = 40  ;;  %s571_s14 = sshll.u32 (!%p1179_p10), %s1062_s13, 3 }
  0x4d   : > { %s231_s16 = scalar_lea.sflag (!%p1179_p10), [#allocation4], %s1062_s13  ;;  %s1068_s17 = scalar_lea.vmem (!%p1179_p10), [#allocation3], %s571_s14 }
  0x51   : > { %879 = dma.done.wait (%p1180_p4), %s231_s16, 128  }
  0x52   : > { %881 = vsyncadd (%p1180_p4), %s231_s16, 4294967168  ;;  %p1181_p8 = scmp.eq.s32.totalorder %s965_s22, 0 }
  0x54   : > { %883 = dma.done.wait (%p1181_p8), [#allocation7], 4096   ;;  %p1182_p3 = pmov %p1181_p8 }
  0x55   : > { %v911_v0 = vmov 0.0   ;;  %vm912_vm0 = vmmov 0   ;;  %v285_v1 = vld [vmem:[#allocation6 + $0x78] sm:$0xff]  ;;  %v284_v2 = vld [vmem:[#allocation6 + $0x70] sm:$0xff]  ;;  %v283_v3 = vld [vmem:[#allocation6 + $0x68] sm:$0xff]  ;;  %s578_s11 = sshll.u32 %s965_s22, 7 }
  0x56   : > { %885 = vsyncadd (%p1182_p3), [#allocation7], 4294963200  ;;  %615 = vmatprep.subr.mxu0 %v911_v0  ;;  %647 = vmatprep.mubr.msk.f32.mxu0 %vm912_vm0, %v911_v0  ;;  %v282_v4 = vld [vmem:[#allocation6 + $0x60] sm:$0xff]  ;;  %v381_v5 = vld [vmem:[#allocation8 + $0x78] sm:$0xff]  ;;  %s268_s12 = scalar_lea.vmem [#allocation9], %s571_s14  ;;  %s1125_s28 = scalar_lea.hbm %s1167_s5, %s578_s11 }
  0x57   : > { %650 = vmatprep.subr.mxu1 %v911_v0  ;;  %682 = vmatprep.mubr.msk.f32.mxu1 %vm912_vm0, %v911_v0  ;;  %v281_v6 = vld [vmem:[#allocation6 + $0x58] sm:$0xff]  ;;  %v380_v7 = vld [vmem:[#allocation8 + $0x70] sm:$0xff]  ;;  %v379_v8 = vld [vmem:[#allocation8 + $0x68] sm:$0xff]  ;;  %s474_s30 = sshll.u32 %s268_s12, 4  ;;  %s461_s7 = scalar_lea.sflag [#allocation5], %s1062_s13  ;;  %s475_s30 = int_to_ptr.vmem [resolvable:$true] %s474_s30 }
  0x58   : > { %616 = vmatpush3.msra.mxu0 %v285_v1  ;;  %651 = vmatpush3.msra.mxu1 %v381_v5  ;;  %v280_v9 = vld [vmem:[#allocation6 + $0x50] sm:$0xff]  ;;  %v378_v10 = vld [vmem:[#allocation8 + $0x60] sm:$0xff]  ;;  %v279_v11 = vld [vmem:[#allocation6 + $0x48] sm:$0xff]  ;;  %s836_s9 = scalar_lea.vmem %s475_s30, 128  ;;  %p1183_p0 = scmp.ne.s32.totalorder %s1177_s23, 0 }
  0x59   : > { %617 = vmatprep.subr.mxu0 %v911_v0  ;;  %652 = vmatprep.subr.mxu1 %v911_v0  ;;  %v377_v12 = vld [vmem:[#allocation8 + $0x58] sm:$0xff]  ;;  %v278_v13 = vld [vmem:[#allocation6 + $0x40] sm:$0xff]  ;;  %v376_v14 = vld [vmem:[#allocation8 + $0x50] sm:$0xff]  ;;  %p837_p11 = scmp.ne.s32.totalorder %s475_s30, %s836_s9  ;;  %s913_s22 = smov [#allocation9]  }
  0x5a   : > { %618 = vmatpush3.msra.mxu0 %v284_v2  ;;  %653 = vmatpush3.msra.mxu1 %v380_v7  ;;  %v277_v15 = vld [vmem:[#allocation6 + $0x38] sm:$0xff]  ;;  %v375_v16 = vld [vmem:[#allocation8 + $0x48] sm:$0xff]  ;;  %v276_v17 = vld [vmem:[#allocation6 + $0x30] sm:$0xff]  ;;  %s840_s16 = sshll.u32 %s913_s22, 4  ;;  %s841_s16 = int_to_ptr.vmem [resolvable:$false] %s840_s16 }
  0x5b   : > { %619 = vmatprep.subr.mxu0 %v911_v0  ;;  %654 = vmatprep.subr.mxu1 %v911_v0  ;;  %v374_v18 = vld [vmem:[#allocation8 + $0x40] sm:$0xff]  ;;  %v275_v19 = vld [vmem:[#allocation6 + $0x28] sm:$0xff]  ;;  %v373_v20 = vld [vmem:[#allocation8 + $0x38] sm:$0xff]  ;;  %p838_p1 = pnand %p837_p11, %p1183_p0  ;;  %s842_s14 = scalar_lea.vmem %s841_s16, 256 }
  0x5c   : > { %620 = vmatpush3.msra.mxu0 %v283_v3  ;;  %655 = vmatpush3.msra.mxu1 %v379_v8  ;;  %v274_v21 = vld [vmem:[#allocation6 + $0x20] sm:$0xff]  ;;  %v372_v22 = vld [vmem:[#allocation8 + $0x30] sm:$0xff]  ;;  %v273_v23 = vld [vmem:[#allocation6 + $0x18] sm:$0xff]  ;;  %p843_p6 = scmp.lt.s32.totalorder %s475_s30, %s841_s16  ;;  %p844_p12 = scmp.lt.s32.totalorder %s842_s14, %s836_s9 }
  0x5d   : > { %621 = vmatprep.subr.mxu0 %v911_v0  ;;  %656 = vmatprep.subr.mxu1 %v911_v0  ;;  %v371_v24 = vld [vmem:[#allocation8 + $0x28] sm:$0xff]  ;;  %v272_v25 = vld [vmem:[#allocation6 + $0x10] sm:$0xff]  ;;  %v370_v26 = vld [vmem:[#allocation8 + $0x20] sm:$0xff]  ;;  %p839_p2 = pneg %p838_p1 }
  0x5e   : > { %622 = vmatpush3.msra.mxu0 %v282_v4  ;;  %657 = vmatpush3.msra.mxu1 %v378_v10  ;;  %v271_v27 = vld [vmem:[#allocation6 + $0x8] sm:$0xff]  ;;  %v369_v28 = vld [vmem:[#allocation8 + $0x18] sm:$0xff]  ;;  %v270_v29 = vld [vmem:[#allocation6] sm:$0xff]  ;;  %p845_p7 = por %p844_p12, %p843_p6 }
  0x5f   : > { %623 = vmatprep.subr.mxu0 %v911_v0  ;;  %658 = vmatprep.subr.mxu1 %v911_v0  ;;  %v269_v30 = vld [vmem:[%s1068_s17] sm:$0xff]  ;;  %v367_v32 = vld [vmem:[#allocation8 + $0x8] sm:$0xff]  ;;  %v366_v33 = vld [vmem:[#allocation8] sm:$0xff] }
  0x60   : > { %624 = vmatpush3.msra.mxu0 %v281_v6  ;;  %659 = vmatpush3.msra.mxu1 %v377_v12  ;;  %v368_v31 = vld [vmem:[#allocation8 + $0x10] sm:$0xff]  ;;  %p846_p9 = pnand %p845_p7, %p839_p2 }
  0x61   : > { %625 = vmatprep.subr.mxu0 %v911_v0  ;;  %660 = vmatprep.subr.mxu1 %v911_v0  ;;  %v575_v34 = vld [vmem:[%s1164_s2] ss:$0 sm:$0xff] }
  0x62   : > { %626 = vmatpush3.msra.mxu0 %v280_v9  ;;  %661 = vmatpush3.msra.mxu1 %v376_v14  ;;  %v576_v39 = vld [vmem:[%s1166_s4] ss:$0 sm:$0xff] }
  0x63   : > { %627 = vmatprep.subr.mxu0 %v911_v0  ;;  %662 = vmatprep.subr.mxu1 %v911_v0 }
  0x64   : > { %628 = vmatpush3.msra.mxu0 %v279_v11  ;;  %663 = vmatpush3.msra.mxu1 %v375_v16 }
  0x65   : > { %629 = vmatprep.subr.mxu0 %v911_v0  ;;  %664 = vmatprep.subr.mxu1 %v911_v0 }
  0x66   : > { %630 = vmatpush3.msra.mxu0 %v278_v13  ;;  %665 = vmatpush3.msra.mxu1 %v374_v18 }
  0x67   : > { %631 = vmatprep.subr.mxu0 %v911_v0  ;;  %666 = vmatprep.subr.mxu1 %v911_v0 }
  0x68   : > { %632 = vmatpush3.msra.mxu0 %v277_v15  ;;  %667 = vmatpush3.msra.mxu1 %v373_v20 }
  0x69   : > { %633 = vmatprep.subr.mxu0 %v911_v0  ;;  %668 = vmatprep.subr.mxu1 %v911_v0 }
  0x6a   : > { %634 = vmatpush3.msra.mxu0 %v276_v17  ;;  %669 = vmatpush3.msra.mxu1 %v372_v22 }
  0x6b   : > { %635 = vmatprep.subr.mxu0 %v911_v0  ;;  %670 = vmatprep.subr.mxu1 %v911_v0 }
  0x6c   : > { %636 = vmatpush3.msra.mxu0 %v275_v19  ;;  %671 = vmatpush3.msra.mxu1 %v371_v24 }
  0x6d   : > { %637 = vmatprep.subr.mxu0 %v911_v0  ;;  %672 = vmatprep.subr.mxu1 %v911_v0 }
  0x6e   : > { %638 = vmatpush3.msra.mxu0 %v274_v21  ;;  %673 = vmatpush3.msra.mxu1 %v370_v26 }
  0x6f   : > { %639 = vmatprep.subr.mxu0 %v911_v0  ;;  %674 = vmatprep.subr.mxu1 %v911_v0 }
  0x70   : > { %640 = vmatpush3.msra.mxu0 %v273_v23  ;;  %675 = vmatpush3.msra.mxu1 %v369_v28 }
  0x71   : > { %641 = vmatprep.subr.mxu0 %v911_v0  ;;  %676 = vmatprep.subr.mxu1 %v911_v0 }
  0x72   : > { %642 = vmatpush3.msra.mxu0 %v272_v25  ;;  %677 = vmatpush3.msra.mxu1 %v368_v31 }
  0x73   : > { %643 = vmatprep.subr.mxu0 %v911_v0  ;;  %678 = vmatprep.subr.mxu1 %v911_v0 }
  0x74   : > { %644 = vmatpush3.msra.mxu0 %v271_v27  ;;  %679 = vmatpush3.msra.mxu1 %v367_v32 }
  0x75   : > { %645 = vmatprep.subr.mxu0 %v911_v0  ;;  %680 = vmatprep.subr.mxu1 %v911_v0 }
  0x76   : > { %646 = vmatpush3.msra.mxu0 %v270_v29  ;;  %681 = vmatpush3.msra.mxu1 %v366_v33 }
  0x77   : > { %648 = vmatmul.mubr.f32.vlgmr.msra.gmra.mxu0 %v269_v30 }
 0x137   : > { %v359_v35 = vpop.f32.mrf.mxu0 }
 0x138   : > { %v360_v36 = vadd.f32 %v575_v34, %v359_v35 }
 0x139   : > { %v649_v37 = vpop.f32.mrf.mxu0 }
 0x13a   : > { %v363_v38 = vmax.f32 %v360_v36, 0.0 }
 0x13c   : > { %683 = vmatmul.mubr.f32.vlgmr.msra.gmra.mxu1 %v363_v38 }
 0x1fc   : > { %v455_v40 = vpop.f32.mrf.mxu1 }
 0x1fd   : > { %v456_v41 = vadd.f32 %v576_v39, %v455_v40 }
 0x1fe   : > { %v684_v42 = vpop.f32.mrf.mxu1 }
 0x1ff   : > { %459 = vst [vmem:[%s268_s12] sm:$0xff] %v456_v41 }
 0x200   : > { %849 = shalt.err (!%p846_p9)
}
 0x201   : > { %s850_s17 = scalar_lea.hbm %s1125_s28, 128  ;;  %s854_s26 = scalar_lea.hbm %s1167_s5, 256 }
 0x202   : > { %p851_p13 = scmp.ne.s32.totalorder %s1125_s28, %s850_s17  ;;  %p855_p4 = scmp.lt.s32.totalorder %s1125_s28, %s1167_s5 }
 0x203   : > { %p856_p8 = scmp.lt.s32.totalorder %s854_s26, %s850_s17 }
 0x204   : > { %p852_p5 = pnand %p851_p13, %p1183_p0 }
 0x205   : > { %p857_p3 = por %p856_p8, %p855_p4 }
 0x206   : > { %p853_p10 = pneg %p852_p5 }
 0x208   : > { %p858_p11 = pnand %p857_p3, %p853_p10 }
 0x20a   : > { %861 = shalt.err (!%p858_p11)
}
 0x20b   : > { %695 = dma.vmem_to_hbm [thread:$0]  (%p1183_p0), %s475_s30, 128, %s1125_s28, %s461_s7  }
 0x20c PF: > { %s486_s11 = sand.u32 1, %s892_s18   ;;  %p1184_p1 = scmp.ne.s32.totalorder %s1173_s25, 0 }
 0x20d   : > { %p1185_p2 = scmp.ge.s32.totalorder %s904_s21, 2  ;;  %s487_s12 = scalar_lea.sflag [#allocation5], %s486_s11 }
 0x20f   : > { %p709_p6 = pnand %p1185_p2, %p1184_p1 }
 0x211   : > { %p710_p12 = pneg %p709_p6 }
 0x213   : > { %887 = dma.done.wait (%p710_p12), %s487_s12, 128  }
 0x214   : > { %889 = vsyncadd (%p710_p12), %s487_s12, 4294967168  ;;  %p19_p7 = scmp.ge.s32.totalorder %s1016_s15, 4   ;;  %s1186_s18 = smov %s896_s19 }
 0x215   : > { %s1187_s19 = smov %s900_s20  ;;  %s1188_s20 = smov %s1032_s27 }
 0x216   : > { %s1189_s21 = smov %s1016_s15  ;;  %21 = sbr.rel (!%p19_p7) target bundleno = 6 (0x6), region = 93 }
 0x21b   :  { %492 = vsyncpa [#allocation4], 1 }
 0x21c   :  { %494 = vsyncpa [#allocation4 + $0x1], 1 }
 0x21d   :  { %495 = vsyncpa [#allocation7], 1 }
 0x21e   :  { %496 = vsyncpa [#allocation5], 1 }
 0x21f   :  { %498 = vsyncpa [#allocation5 + $0x1], 1 }

</bundles_post_ra>
